<compile_context>
chip_gen: v5e
topology: v5e:2x2
jax: 0.10.0
libtpu: 0.0.40
codegen_flags: <defaults>
</compile_context>

<pallas_src>
import jax
import jax.numpy as jnp
from jax.experimental import pallas as pl
from jax.experimental.pallas import tpu as pltpu

# ---- module hyperparameters (synthetic, deterministic) ----
INPUT_DIM = 32      # D
NUM_CHANNELS = 8    # C
KERNEL_SIZE = 3     # depthwise kernel size (must be odd)
PAD = (KERNEL_SIZE - 1) // 2
EPS = 1e-5          # LayerNorm / GroupNorm eps (torch default)
BATCH_BLOCK = 2     # batch elements per grid step (keep B // BATCH_BLOCK >= 2)


def conv_module_kernel(x_ref, ln_ref, w1_ref, dw_ref, gn_ref, w2_ref, out_ref):
    bblk, T, D = x_ref.shape
    K, C = dw_ref.shape
    N = bblk * T

    # Parameters: load once, hoist every broadcast out of loops.
    ln = ln_ref[...]                                  # (2, D): [gamma; beta]
    ln_g, ln_b = ln[0:1, :], ln[1:2, :]
    w1 = w1_ref[...]                                  # (D, 2C): fused GLU weight [a | gate]
    dw = dw_ref[...]                                  # (K, C) depthwise taps
    dw_rows = [dw[k:k + 1, :].reshape(1, 1, C) for k in range(K)]
    gn = gn_ref[...]                                  # (2, C): [gamma; beta]
    gn_g = gn[0:1, :].reshape(1, 1, C)
    gn_b = gn[1:2, :].reshape(1, 1, C)
    w2 = w2_ref[...]                                  # (C, D)

    # Flatten the batch block: one (N, D) slab feeds both MXU passes.
    x = x_ref[...].reshape(N, D)

    # --- torch.nn.LayerNorm(input_dim) over the feature axis ---
    mu = jnp.mean(x, axis=-1, keepdims=True)
    xc = x - mu
    var = jnp.mean(xc * xc, axis=-1, keepdims=True)
    xn = xc * jax.lax.rsqrt(var + EPS) * ln_g + ln_b

    # --- Conv1d(D -> 2C, k=1, bias=False) fused + GLU(dim=channels) ---
    y = jnp.dot(xn, w1, preferred_element_type=jnp.float32)    # (N, 2C)
    glu = y[:, :C] * jax.nn.sigmoid(y[:, C:])                  # (N, C)

    # --- Conv1d(C -> C, K, groups=C, padding=(K-1)//2, bias=False) ---
    # Depthwise 'SAME' conv along T: per-sample zero-pad on the time axis and
    # take K static shifted slices.
    glu3 = glu.reshape(bblk, T, C)
    zpad = jnp.zeros((bblk, PAD, C), jnp.float32)
    padded = jnp.concatenate([zpad, glu3, zpad], axis=1)       # (bblk, T+2*PAD, C)
    acc = padded[:, 0:T, :] * dw_rows[0]
    for k in range(1, K):
        acc = acc + padded[:, k:k + T, :] * dw_rows[k]         # (bblk, T, C)

    # --- GroupNorm(num_groups=1): single-pass per-sample stats over (T, C) ---
    inv_n = 1.0 / (T * C)
    s = jnp.sum(jnp.sum(acc, axis=2, keepdims=True), axis=1, keepdims=True)
    s2 = jnp.sum(jnp.sum(acc * acc, axis=2, keepdims=True), axis=1,
                 keepdims=True)
    g_mean = s * inv_n
    g_var = s2 * inv_n - g_mean * g_mean
    gnorm = (acc - g_mean) * jax.lax.rsqrt(g_var + EPS) * gn_g + gn_b

    # --- SiLU, Conv1d(C -> D, k=1, bias=False); Dropout(p=0.0) = identity ---
    z = (gnorm * jax.nn.sigmoid(gnorm)).reshape(N, C)
    out = jnp.dot(z, w2, preferred_element_type=jnp.float32)   # (N, D)
    out_ref[...] = out.reshape(bblk, T, D).astype(out_ref.dtype)


@jax.jit
def conv_module_forward(x, params):
    B, T, D = x.shape
    ln_gb, w1, dw, gn_gb, w2 = params
    K, C = dw.shape
    bblk = BATCH_BLOCK if B % BATCH_BLOCK == 0 else 1
    grid = (B // bblk,)

    def whole(shape):
        n = len(shape)
        return pl.BlockSpec(shape, lambda b, _n=n: (0,) * _n)

    return pl.pallas_call(
        conv_module_kernel,
        out_shape=jax.ShapeDtypeStruct((B, T, D), x.dtype),
        grid_spec=pltpu.PrefetchScalarGridSpec(
            num_scalar_prefetch=0,
            grid=grid,
            in_specs=[
                pl.BlockSpec((bblk, T, D), lambda b: (b, 0, 0)),   # x
                whole((2, D)),        # packed layernorm gamma/beta
                whole((D, 2 * C)),    # fused 1x1 conv (GLU) weight
                whole((K, C)),        # depthwise taps
                whole((2, C)),        # packed groupnorm gamma/beta
                whole((C, D)),        # final 1x1 conv weight
            ],
            out_specs=pl.BlockSpec((bblk, T, D), lambda b: (b, 0, 0)),
        ),
        compiler_params=pltpu.CompilerParams(dimension_semantics=("parallel",)),
    )(x, ln_gb, w1, dw, gn_gb, w2)


def conv_module_reference(x, params):
    """Pure-JAX reference (same math as the PyTorch module, GroupNorm branch)."""
    ln_gb, w1, dw, gn_gb, w2 = params
    C = w2.shape[0]
    ln_g, ln_b = ln_gb[0:1], ln_gb[1:2]
    gn_g, gn_b = gn_gb[0:1], gn_gb[1:2]
    mean = jnp.mean(x, axis=-1, keepdims=True)
    var = jnp.mean((x - mean) ** 2, axis=-1, keepdims=True)
    xn = (x - mean) / jnp.sqrt(var + EPS) * ln_g + ln_b
    y = jnp.einsum("btd,dc->btc", xn, w1)
    glu = y[..., :C] * jax.nn.sigmoid(y[..., C:])
    T = glu.shape[1]
    padded = jnp.pad(glu, ((0, 0), (PAD, PAD), (0, 0)))
    acc = jnp.zeros_like(glu)
    for k in range(KERNEL_SIZE):
        acc = acc + padded[:, k:k + T, :] * dw[k][None, None, :]
    g_mean = jnp.mean(acc, axis=(1, 2), keepdims=True)
    g_var = jnp.mean((acc - g_mean) ** 2, axis=(1, 2), keepdims=True)
    gn = (acc - g_mean) / jnp.sqrt(g_var + EPS) * gn_g + gn_b
    z = gn * jax.nn.sigmoid(gn)
    return jnp.einsum("btc,cd->btd", z, w2)


if __name__ == "__main__":
    B, T = 4, 16
    D, C, K = INPUT_DIM, NUM_CHANNELS, KERNEL_SIZE

    key = jax.random.PRNGKey(0)
    keys = jax.random.split(key, 9)
    x = jax.random.normal(keys[0], (B, T, D), jnp.float32)
    ln_g = 1.0 + 0.1 * jax.random.normal(keys[1], (1, D), jnp.float32)
    ln_b = 0.1 * jax.random.normal(keys[2], (1, D), jnp.float32)
    w1a = 0.1 * jax.random.normal(keys[3], (D, C), jnp.float32)   # GLU 'a' half
    w1b = 0.1 * jax.random.normal(keys[4], (D, C), jnp.float32)   # GLU gate half
    dw = 0.1 * jax.random.normal(keys[5], (K, C), jnp.float32)    # depthwise taps
    gn_g = 1.0 + 0.1 * jax.random.normal(keys[6], (1, C), jnp.float32)
    gn_b = 0.1 * jax.random.normal(keys[7], (1, C), jnp.float32)
    w2 = 0.1 * jax.random.normal(keys[8], (C, D), jnp.float32)

    # Pack small parameters (fewer DMA descriptors / VMEM tile padding waste).
    ln_gb = jnp.concatenate([ln_g, ln_b], axis=0)    # (2, D)
    w1 = jnp.concatenate([w1a, w1b], axis=1)         # (D, 2C) = [a | gate]
    gn_gb = jnp.concatenate([gn_g, gn_b], axis=0)    # (2, C)
    params = (ln_gb, w1, dw, gn_gb, w2)

    out = jax.block_until_ready(conv_module_forward(x, params))

    ref = conv_module_reference(x, params)
    assert out.shape == (B, T, D), out.shape
    max_err = float(jnp.max(jnp.abs(out - ref)))
    assert jnp.allclose(out, ref, rtol=1e-2, atol=1e-2), f"max_err={max_err}"
    print("KERNEL_OK")
</pallas_src>

<mosaic_0001>
module attributes {stable_mosaic.version = 11 : i64} {
  func.func @conv_module_kernel(%arg0: i32, %arg1: memref<2x16x32xf32, #tpu.memory_space<vmem>>, %arg2: memref<2x32xf32, #tpu.memory_space<vmem>>, %arg3: memref<32x16xf32, #tpu.memory_space<vmem>>, %arg4: memref<3x8xf32, #tpu.memory_space<vmem>>, %arg5: memref<2x8xf32, #tpu.memory_space<vmem>>, %arg6: memref<8x32xf32, #tpu.memory_space<vmem>>, %arg7: memref<2x16x32xf32, #tpu.memory_space<vmem>>) attributes {dimension_semantics = [#tpu.dimension_semantics<parallel>], iteration_bounds = array<i64: 2>, scalar_prefetch = 0 : i64, scratch_operands = 0 : i64, tpu.core_type = #tpu.core_type<tc>, window_params = [{transform_indices = @transform_0, window_bounds = array<i64: 2, 16, 32>}, {pipeline_mode = #tpu.pipeline_mode<synchronous>, transform_indices = @transform_1, window_bounds = array<i64: 2, 32>}, {pipeline_mode = #tpu.pipeline_mode<synchronous>, transform_indices = @transform_2, window_bounds = array<i64: 32, 16>}, {pipeline_mode = #tpu.pipeline_mode<synchronous>, transform_indices = @transform_3, window_bounds = array<i64: 3, 8>}, {pipeline_mode = #tpu.pipeline_mode<synchronous>, transform_indices = @transform_4, window_bounds = array<i64: 2, 8>}, {pipeline_mode = #tpu.pipeline_mode<synchronous>, transform_indices = @transform_5, window_bounds = array<i64: 8, 32>}, {transform_indices = @transform_6, window_bounds = array<i64: 2, 16, 32>}]} {
    %c0 = arith.constant 0 : index
    %c0_0 = arith.constant 0 : index
    %0 = vector.load %arg2[%c0, %c0_0] : memref<2x32xf32, #tpu.memory_space<vmem>>, vector<2x32xf32>
    %1 = vector.extract_strided_slice %0 {offsets = [0, 0], sizes = [1, 32], strides = [1, 1]} : vector<2x32xf32> to vector<1x32xf32>
    %2 = vector.extract_strided_slice %0 {offsets = [1, 0], sizes = [1, 32], strides = [1, 1]} : vector<2x32xf32> to vector<1x32xf32>
    %c0_1 = arith.constant 0 : index
    %c0_2 = arith.constant 0 : index
    %3 = vector.load %arg3[%c0_1, %c0_2] : memref<32x16xf32, #tpu.memory_space<vmem>>, vector<32x16xf32>
    %c0_3 = arith.constant 0 : index
    %c0_4 = arith.constant 0 : index
    %4 = vector.load %arg4[%c0_3, %c0_4] : memref<3x8xf32, #tpu.memory_space<vmem>>, vector<3x8xf32>
    %5 = vector.extract_strided_slice %4 {offsets = [0, 0], sizes = [1, 8], strides = [1, 1]} : vector<3x8xf32> to vector<1x8xf32>
    %6 = vector.shape_cast %5 : vector<1x8xf32> to vector<1x1x8xf32>
    %7 = vector.extract_strided_slice %4 {offsets = [1, 0], sizes = [1, 8], strides = [1, 1]} : vector<3x8xf32> to vector<1x8xf32>
    %8 = vector.shape_cast %7 : vector<1x8xf32> to vector<1x1x8xf32>
    %9 = vector.extract_strided_slice %4 {offsets = [2, 0], sizes = [1, 8], strides = [1, 1]} : vector<3x8xf32> to vector<1x8xf32>
    %10 = vector.shape_cast %9 : vector<1x8xf32> to vector<1x1x8xf32>
    %c0_5 = arith.constant 0 : index
    %c0_6 = arith.constant 0 : index
    %11 = vector.load %arg5[%c0_5, %c0_6] : memref<2x8xf32, #tpu.memory_space<vmem>>, vector<2x8xf32>
    %12 = vector.extract_strided_slice %11 {offsets = [0, 0], sizes = [1, 8], strides = [1, 1]} : vector<2x8xf32> to vector<1x8xf32>
    %13 = vector.shape_cast %12 : vector<1x8xf32> to vector<1x1x8xf32>
    %14 = vector.extract_strided_slice %11 {offsets = [1, 0], sizes = [1, 8], strides = [1, 1]} : vector<2x8xf32> to vector<1x8xf32>
    %15 = vector.shape_cast %14 : vector<1x8xf32> to vector<1x1x8xf32>
    %c0_7 = arith.constant 0 : index
    %c0_8 = arith.constant 0 : index
    %16 = vector.load %arg6[%c0_7, %c0_8] : memref<8x32xf32, #tpu.memory_space<vmem>>, vector<8x32xf32>
    %c0_9 = arith.constant 0 : index
    %c0_10 = arith.constant 0 : index
    %c0_11 = arith.constant 0 : index
    %17 = vector.load %arg1[%c0_9, %c0_10, %c0_11] : memref<2x16x32xf32, #tpu.memory_space<vmem>>, vector<2x16x32xf32>
    %18 = vector.shape_cast %17 : vector<2x16x32xf32> to vector<32x32xf32>
    %cst = arith.constant dense<0.000000e+00> : vector<32xf32>
    %19 = vector.multi_reduction <add>, %18, %cst [1] : vector<32x32xf32> to vector<32xf32>
    %20 = vector.shape_cast %19 : vector<32xf32> to vector<32x1xf32>
    %cst_12 = arith.constant 3.200000e+01 : f32
    %21 = vector.broadcast %cst_12 : f32 to vector<32x1xf32>
    %22 = arith.divf %20, %21 : vector<32x1xf32>
    %23 = vector.broadcast %22 : vector<32x1xf32> to vector<32x32xf32>
    %24 = arith.subf %18, %23 : vector<32x32xf32>
    %25 = arith.mulf %24, %24 : vector<32x32xf32>
    %cst_13 = arith.constant dense<0.000000e+00> : vector<32xf32>
    %26 = vector.multi_reduction <add>, %25, %cst_13 [1] : vector<32x32xf32> to vector<32xf32>
    %27 = vector.shape_cast %26 : vector<32xf32> to vector<32x1xf32>
    %cst_14 = arith.constant 3.200000e+01 : f32
    %28 = vector.broadcast %cst_14 : f32 to vector<32x1xf32>
    %29 = arith.divf %27, %28 : vector<32x1xf32>
    %cst_15 = arith.constant 9.99999974E-6 : f32
    %30 = vector.broadcast %cst_15 : f32 to vector<32x1xf32>
    %31 = arith.addf %29, %30 : vector<32x1xf32>
    %32 = math.rsqrt %31 : vector<32x1xf32>
    %33 = vector.broadcast %32 : vector<32x1xf32> to vector<32x32xf32>
    %34 = arith.mulf %24, %33 : vector<32x32xf32>
    %35 = vector.broadcast %1 : vector<1x32xf32> to vector<32x32xf32>
    %36 = arith.mulf %34, %35 : vector<32x32xf32>
    %37 = vector.broadcast %2 : vector<1x32xf32> to vector<32x32xf32>
    %38 = arith.addf %36, %37 : vector<32x32xf32>
    %cst_16 = arith.constant dense<0.000000e+00> : vector<32x16xf32>
    %39 = tpu.matmul %38, %3, %cst_16 {dimension_numbers = #tpu.dot_dimension_numbers<[1], [0], [0], [1], [0, 0, 1, 1], [], []>} : vector<32x32xf32>, vector<32x16xf32>, vector<32x16xf32> -> vector<32x16xf32>
    %40 = vector.extract_strided_slice %39 {offsets = [0, 0], sizes = [32, 8], strides = [1, 1]} : vector<32x16xf32> to vector<32x8xf32>
    %41 = vector.extract_strided_slice %39 {offsets = [0, 8], sizes = [32, 8], strides = [1, 1]} : vector<32x16xf32> to vector<32x8xf32>
    %42 = arith.negf %41 : vector<32x8xf32>
    %43 = math.exp %42 : vector<32x8xf32>
    %cst_17 = arith.constant 1.000000e+00 : f32
    %44 = vector.broadcast %cst_17 : f32 to vector<32x8xf32>
    %45 = arith.addf %44, %43 : vector<32x8xf32>
    %46 = arith.divf %44, %45 : vector<32x8xf32>
    %47 = arith.mulf %40, %46 : vector<32x8xf32>
    %48 = vector.shape_cast %47 : vector<32x8xf32> to vector<2x16x8xf32>
    %cst_18 = arith.constant 0.000000e+00 : f32
    %49 = vector.broadcast %cst_18 : f32 to vector<2x1x8xf32>
    %50 = tpu.concatenate %49, %48, %49 in 1 : vector<2x1x8xf32>, vector<2x16x8xf32>, vector<2x1x8xf32> -> vector<2x18x8xf32>
    %51 = vector.extract_strided_slice %50 {offsets = [0, 0, 0], sizes = [2, 16, 8], strides = [1, 1, 1]} : vector<2x18x8xf32> to vector<2x16x8xf32>
    %52 = vector.broadcast %6 : vector<1x1x8xf32> to vector<2x16x8xf32>
    %53 = arith.mulf %51, %52 : vector<2x16x8xf32>
    %54 = vector.extract_strided_slice %50 {offsets = [0, 1, 0], sizes = [2, 16, 8], strides = [1, 1, 1]} : vector<2x18x8xf32> to vector<2x16x8xf32>
    %55 = vector.broadcast %8 : vector<1x1x8xf32> to vector<2x16x8xf32>
    %56 = arith.mulf %54, %55 : vector<2x16x8xf32>
    %57 = arith.addf %53, %56 : vector<2x16x8xf32>
    %58 = vector.extract_strided_slice %50 {offsets = [0, 2, 0], sizes = [2, 16, 8], strides = [1, 1, 1]} : vector<2x18x8xf32> to vector<2x16x8xf32>
    %59 = vector.broadcast %10 : vector<1x1x8xf32> to vector<2x16x8xf32>
    %60 = arith.mulf %58, %59 : vector<2x16x8xf32>
    %61 = arith.addf %57, %60 : vector<2x16x8xf32>
    %cst_19 = arith.constant dense<0.000000e+00> : vector<2x16xf32>
    %62 = vector.multi_reduction <add>, %61, %cst_19 [2] : vector<2x16x8xf32> to vector<2x16xf32>
    %63 = vector.shape_cast %62 : vector<2x16xf32> to vector<2x16x1xf32>
    %cst_20 = arith.constant dense<0.000000e+00> : vector<2x1xf32>
    %64 = vector.multi_reduction <add>, %63, %cst_20 [1] : vector<2x16x1xf32> to vector<2x1xf32>
    %65 = vector.shape_cast %64 : vector<2x1xf32> to vector<2x1x1xf32>
    %66 = arith.mulf %61, %61 : vector<2x16x8xf32>
    %cst_21 = arith.constant dense<0.000000e+00> : vector<2x16xf32>
    %67 = vector.multi_reduction <add>, %66, %cst_21 [2] : vector<2x16x8xf32> to vector<2x16xf32>
    %68 = vector.shape_cast %67 : vector<2x16xf32> to vector<2x16x1xf32>
    %cst_22 = arith.constant dense<0.000000e+00> : vector<2x1xf32>
    %69 = vector.multi_reduction <add>, %68, %cst_22 [1] : vector<2x16x1xf32> to vector<2x1xf32>
    %70 = vector.shape_cast %69 : vector<2x1xf32> to vector<2x1x1xf32>
    %cst_23 = arith.constant 7.812500e-03 : f32
    %71 = vector.broadcast %cst_23 : f32 to vector<2x1x1xf32>
    %72 = arith.mulf %65, %71 : vector<2x1x1xf32>
    %cst_24 = arith.constant 7.812500e-03 : f32
    %73 = vector.broadcast %cst_24 : f32 to vector<2x1x1xf32>
    %74 = arith.mulf %70, %73 : vector<2x1x1xf32>
    %75 = arith.mulf %72, %72 : vector<2x1x1xf32>
    %76 = arith.subf %74, %75 : vector<2x1x1xf32>
    %77 = vector.broadcast %72 : vector<2x1x1xf32> to vector<2x16x8xf32>
    %78 = arith.subf %61, %77 : vector<2x16x8xf32>
    %cst_25 = arith.constant 9.99999974E-6 : f32
    %79 = vector.broadcast %cst_25 : f32 to vector<2x1x1xf32>
    %80 = arith.addf %76, %79 : vector<2x1x1xf32>
    %81 = math.rsqrt %80 : vector<2x1x1xf32>
    %82 = vector.broadcast %81 : vector<2x1x1xf32> to vector<2x16x8xf32>
    %83 = arith.mulf %78, %82 : vector<2x16x8xf32>
    %84 = vector.broadcast %13 : vector<1x1x8xf32> to vector<2x16x8xf32>
    %85 = arith.mulf %83, %84 : vector<2x16x8xf32>
    %86 = vector.broadcast %15 : vector<1x1x8xf32> to vector<2x16x8xf32>
    %87 = arith.addf %85, %86 : vector<2x16x8xf32>
    %88 = arith.negf %87 : vector<2x16x8xf32>
    %89 = math.exp %88 : vector<2x16x8xf32>
    %cst_26 = arith.constant 1.000000e+00 : f32
    %90 = vector.broadcast %cst_26 : f32 to vector<2x16x8xf32>
    %91 = arith.addf %90, %89 : vector<2x16x8xf32>
    %92 = arith.divf %90, %91 : vector<2x16x8xf32>
    %93 = arith.mulf %87, %92 : vector<2x16x8xf32>
    %94 = vector.shape_cast %93 : vector<2x16x8xf32> to vector<32x8xf32>
    %cst_27 = arith.constant dense<0.000000e+00> : vector<32x32xf32>
    %95 = tpu.matmul %94, %16, %cst_27 {dimension_numbers = #tpu.dot_dimension_numbers<[1], [0], [0], [1], [0, 0, 1, 1], [], []>} : vector<32x8xf32>, vector<8x32xf32>, vector<32x32xf32> -> vector<32x32xf32>
    %96 = vector.shape_cast %95 : vector<32x32xf32> to vector<2x16x32xf32>
    %c0_28 = arith.constant 0 : index
    %c0_29 = arith.constant 0 : index
    %c0_30 = arith.constant 0 : index
    %97 = vector.load %arg7[%c0_28, %c0_29, %c0_30] : memref<2x16x32xf32, #tpu.memory_space<vmem>>, vector<2x16x32xf32>
    tpu.vector_store %arg7[%c0_28, %c0_29, %c0_30], %96 {strides = array<i32>} : memref<2x16x32xf32, #tpu.memory_space<vmem>>, vector<2x16x32xf32>,
    return
  }
  func.func @transform_0(%arg0: i32) -> (i32, i32, i32) {
    %c0_i32 = arith.constant 0 : i32
    %c0_i32_0 = arith.constant 0 : i32
    %c0_i32_1 = arith.constant 0 : i32
    return %arg0, %c0_i32, %c0_i32_0 : i32, i32, i32
  }
  func.func @transform_1(%arg0: i32) -> (i32, i32) {
    %c0_i32 = arith.constant 0 : i32
    %c0_i32_0 = arith.constant 0 : i32
    %c0_i32_1 = arith.constant 0 : i32
    return %c0_i32, %c0_i32_0 : i32, i32
  }
  func.func @transform_2(%arg0: i32) -> (i32, i32) {
    %c0_i32 = arith.constant 0 : i32
    %c0_i32_0 = arith.constant 0 : i32
    %c0_i32_1 = arith.constant 0 : i32
    return %c0_i32, %c0_i32_0 : i32, i32
  }
  func.func @transform_3(%arg0: i32) -> (i32, i32) {
    %c0_i32 = arith.constant 0 : i32
    %c0_i32_0 = arith.constant 0 : i32
    %c0_i32_1 = arith.constant 0 : i32
    return %c0_i32, %c0_i32_0 : i32, i32
  }
  func.func @transform_4(%arg0: i32) -> (i32, i32) {
    %c0_i32 = arith.constant 0 : i32
    %c0_i32_0 = arith.constant 0 : i32
    %c0_i32_1 = arith.constant 0 : i32
    return %c0_i32, %c0_i32_0 : i32, i32
  }
  func.func @transform_5(%arg0: i32) -> (i32, i32) {
    %c0_i32 = arith.constant 0 : i32
    %c0_i32_0 = arith.constant 0 : i32
    %c0_i32_1 = arith.constant 0 : i32
    return %c0_i32, %c0_i32_0 : i32, i32
  }
  func.func @transform_6(%arg0: i32) -> (i32, i32, i32) {
    %c0_i32 = arith.constant 0 : i32
    %c0_i32_0 = arith.constant 0 : i32
    %c0_i32_1 = arith.constant 0 : i32
    return %arg0, %c0_i32, %c0_i32_0 : i32, i32, i32
  }
}

</mosaic_0001>

<bundles_post_ra>
// kernel: conv_module_forward.1
= control target key start
LH: loop header
LB: loop body
LE: loop exit
PB: predicated region body
PF: predicated region fallthrough
CT: control target
= control target key end

     0   :  { %11 = vsyncpa [#allocation3], 0  ;;  %s1495_s0 = inlined_call_operand.hbm [shape: f32[4,16,32], index: 0, kind: input, shape index: {}]   ;;  %s1496_s1 = inlined_call_operand.vmem [shape: f32[2,32], index: 1, kind: input, shape index: {}]   ;;  %s1497_s2 = inlined_call_operand.vmem [shape: f32[32,16], index: 2, kind: input, shape index: {}]   ;;  %s1498_s3 = inlined_call_operand.vmem [shape: f32[3,8], index: 3, kind: input, shape index: {}]   ;;  %s1499_s4 = inlined_call_operand.vmem [shape: f32[2,8], index: 4, kind: input, shape index: {}]   ;;  %s1500_s5 = inlined_call_operand.vmem [shape: f32[8,32], index: 5, kind: input, shape index: {}]   ;;  %s1501_s6 = inlined_call_operand.hbm [shape: f32[4,16,32], index: 6, kind: output, shape index: {}]  }
   0x1   :  { %13 = vsyncpa [#allocation3 + $0x1], 0 }
   0x2   :  { %14 = vsyncpa [#allocation4], 0 }
   0x3   :  { %16 = vsyncpa [#allocation4 + $0x1], 0  ;;  %s1218_s21 = smov 0   ;;  %s1220_s22 = smov 0  }
   0x4   :  { %s1222_s23 = smov 0   ;;  %s1224_s24 = smov 0  }
   0x5 LB: > { %s1239_s25 = sadd.s32 4294967295, %s1175_s24   ;;  %s940_s26 = sadd.s32 4294967294, %s1175_s24   ;;  %s1175_s24 = sphi %s1224_s24, %s1511_s24   ;;  %s1171_s23 = sphi %s1222_s23, %s1510_s23   ;;  %s1167_s22 = sphi %s1220_s22, %s1509_s22   ;;  %s1163_s21 = sphi %s1218_s21, %s1508_s21  }
   0x6   : > { %s1243_s27 = sadd.s32 1, %s1175_s24   ;;  %s29_s28 = sadd.s32 1, %s1171_s23 }
   0x7   : > { %s26_s29 = ssub.s32 %s1175_s24, %s1243_s27  ;;  %p36_p0 = scmp.ne.s32.totalorder %s1171_s23, %s1167_s22 }
   0x8   : > { %p27_p1 = scmp.eq.s32.totalorder %s26_s29, 0  ;;  %p37_p2 = scmp.eq.s32.totalorder %s1175_s24, 0 }
   0x9   : > { %p42_p3 = scmp.ne.s32.totalorder %s1167_s22, %s1163_s21  ;;  %p43_p4 = scmp.eq.s32.totalorder %s1239_s25, 0 }
   0xa   : > { %s1255_s30 = scalar_select %p27_p1, %s1171_s23, %s29_s28  }
   0xb   : > { %p1257_p5 = por %p37_p2, %p36_p0  ;;  %p1261_p6 = por %p43_p4, %p42_p3 }
   0xc   : > { %p171_p7 = scmp.eq.s32.totalorder %s1239_s25, 1  ;;  %p177_p8 = scmp.eq.s32.totalorder %s940_s26, 1 }
   0xd   : > { %p993_p10 = scmp.lt.s32.totalorder %s1175_s24, 2  ;;  %s212_s11 = sand.u32 1, %s1171_s23  }
   0xe   : > { %p1268_p11 = por %p171_p7, %p36_p0  ;;  %p1272_p12 = por %p177_p8, %p42_p3 }
   0xf   : > { %s973_s12 = sshll.u32 %s1175_s24, 5  ;;  %s943_s13 = sshll.u32 %s212_s11, 5 }
  0x10   : > { %s222_s16 = scalar_lea.hbm %s1495_s0, %s973_s12  ;;  %s216_s18 = scalar_lea.vmem [#allocation2], %s943_s13 }
  0x11   : > { %s223_s17 = sshll.u32 %s222_s16, 4  ;;  %s225_s19 = sshll.u32 %s216_s18, 4  ;;  %s224_s17 = int_to_ptr.hbm [resolvable:$true] %s223_s17  ;;  %s226_s19 = int_to_ptr.vmem [resolvable:$true] %s225_s19 }
  0x12   : > { %p1283_p13 = pnand %p993_p10, %p1257_p5  ;;  %p947_p0 = scmp.ge.s32.totalorder %s1175_s24, 1 }
  0x13   : > { %p233_p1 = scmp.lt.s32.totalorder %s1175_s24, 3  ;;  %s213_s26 = scalar_lea.sflag [#allocation3], %s212_s11 }
  0x14   : > { %s1079_s28 = sshra.s32 %s224_s17, 4  ;;  %p1083_p3 = pneg %p1283_p13  ;;  %s1080_s28 = int_to_ptr.hbm [resolvable:$true] %s1079_s28 }
  0x15   : > { %s1081_s29 = scalar_lea.hbm %s1080_s28, 32  ;;  %s1086_s7 = scalar_lea.hbm %s1495_s0, 64 }
  0x16   : > { %p1082_p2 = scmp.ne.s32.totalorder %s1080_s28, %s1081_s29  ;;  %p1087_p5 = scmp.lt.s32.totalorder %s1080_s28, %s1495_s0 }
  0x17   : > { %p1088_p8 = scmp.lt.s32.totalorder %s1086_s7, %s1081_s29 }
  0x18   : > { %p1084_p4 = pnand %p1083_p3, %p1082_p2 }
  0x19   : > { %p1089_p10 = por %p1088_p8, %p1087_p5 }
  0x1a   : > { %p1085_p7 = pneg %p1084_p4 }
  0x1c   : > { %p1090_p9 = pnand %p1089_p10, %p1085_p7 }
  0x1e   : > { %1093 = shalt.err (!%p1090_p9)
}
  0x1f   : > { %s1177_s11 = smov 128   ;;  %s1178_s16 = smov 8  }
  0x20   : > { %988 = dma.hbm_to_vmem [thread:$0]  (!%p1283_p13), %s224_s17, 512, %s226_s19, %s213_s26, %s1177_s11, %s1177_s11, %s1178_s16  }
  0x21   : > { %p234_p2 = pnand %p947_p0, %p233_p1 }
  0x22   : > { %s1304_s18 = sand.u32 (!%p234_p2), 1, %s1167_s22  }
  0x23   : > { %237 = sbr.rel (%p234_p2) target bundleno = 956 (0x3bc), region = 44  ;;  %s948_s28 = sshll.u32 (!%p234_p2), %s1304_s18, 5 }
  0x24   : > { %s240_s29 = scalar_lea.sflag (!%p234_p2), [#allocation3], %s1304_s18  ;;  %s243_s12 = scalar_lea.vmem (!%p234_p2), [#allocation2], %s948_s28 }
  0x28   : > { %1154 = dma.done.wait (%p1261_p6), %s240_s29, 512  }
  0x29   : > { %1156 = vsyncadd (%p1261_p6), %s240_s29, 4294966784  ;;  %vm287_vm0 = vcmask 261120   ;;  %v284_v0 = vld [vmem:[%s243_s12 + $0x8] sm:$0xff]  ;;  %v283_v1 = vld [vmem:[%s243_s12] sm:$0xff]  ;;  %v1179_v8 = vmov 32.0   ;;  %s1180_s16 = smov 120  }
  0x2a   : > { %v291_v2 = vsel %vm287_vm0, %v284_v0, 0.0  ;;  %v288_v3 = vsel %vm287_vm0, %v283_v1, 0.0  ;;  %v286_v4 = vld [vmem:[%s243_s12 + $0x18] sm:$0xff]  ;;  %v285_v5 = vld [vmem:[%s243_s12 + $0x10] sm:$0xff]  ;;  %1033 = vrcp.f32 %v1179_v8  ;;  %v277_v37 = vld [vmem:[%s1497_s2 + $0x8] sm:$0xff]  ;;  %s272_s26 = scalar_lea.vmem [#allocation5], %s948_s28 }
  0x2b   : > { %292 = vadd.xlane.f32.xlu1 %v291_v2  ;;  %289 = vadd.xlane.f32.xlu0 %v288_v3  ;;  %v297_v6 = vsel %vm287_vm0, %v286_v4, 0.0  ;;  %v294_v7 = vsel %vm287_vm0, %v285_v5, 0.0  ;;  %v279_v35 = vld [vmem:[%s1497_s2 + $0x18] sm:$0xff]  ;;  %v278_v36 = vld [vmem:[%s1497_s2 + $0x10] sm:$0xff]  ;;  %v276_v38 = vld [vmem:[%s1497_s2] sm:$0xff]  ;;  %s975_s13 = sshll.u32 %s1239_s25, 5 }
  0x2c   : > { %417 = vmatpush.msra.mxu0 %v279_v35  ;;  %976 = vmatpush.msra.mxu2 %v279_v35  ;;  %v275_v60 = vld [vmem:[%s1496_s1] sm:$0x3]  ;;  %s863_s15 = scalar_lea.hbm %s1501_s6, %s975_s13  ;;  %s864_s11 = sshll.u32 %s272_s26, 4  ;;  %s865_s11 = int_to_ptr.vmem [resolvable:$true] %s864_s11 }
  0x2d   : > { %s851_s28 = scalar_lea.sflag [#allocation4], %s1304_s18  ;;  %s1129_s17 = scalar_lea.hbm %s1501_s6, 64 }
  0x2e   : > { %418 = vmatpush.msra.mxu0 %v278_v36  ;;  %977 = vmatpush.msra.mxu2 %v278_v36 }
  0x30   : > { %v1034_v9 = vpop.eup %1033  ;;  %419 = vmatpush.msra.mxu0 %v277_v37  ;;  %978 = vmatpush.msra.mxu2 %v277_v37 }
  0x31   : > { %v301_v10 = vmul.f32 32.0, %v1034_v9  ;;  %vm305_vm1 = vweird.f32 %v1034_v9 }
  0x32   : > { %420 = vmatpush.msra.mxu0 %v276_v38  ;;  %979 = vmatpush.msra.mxu2 %v276_v38 }
  0x33   : > { %298 = vadd.xlane.f32.xlu1 %v297_v6  ;;  %295 = vadd.xlane.f32.xlu0 %v294_v7  ;;  %v302_v11 = vsub.f32 1.0, %v301_v10 }
  0x35   : > { %v303_v12 = vmul.f32 %v1034_v9, %v302_v11 }
  0x37   : > { %v304_v13 = vadd.f32 %v1034_v9, %v303_v12 }
  0x39   : > { %v306_v14 = vsel %vm305_vm1, %v1034_v9, %v304_v13  ;;  %v388_v9 = vperm.slane %v275_v60, 1 }
  0x9e   : > { %v293_v15 = vpop.xlane.xlu1 %292  ;;  %v290_v16 = vpop.xlane.xlu0 %289 }
  0x9f   : > { %v308_v17 = vmul.f32 %v306_v14, %v293_v15  ;;  %v307_v18 = vmul.f32 %v306_v14, %v290_v16 }
  0xa1   : > { %v1318_v19 = vsub.f32 %v284_v0, %v308_v17  ;;  %v1320_v20 = vsub.f32 %v283_v1, %v307_v18 }
  0xa3   : > { %v316_v21 = vmul.f32 %v1318_v19, %v1318_v19  ;;  %v315_v22 = vmul.f32 %v1320_v20, %v1320_v20 }
  0xa5   : > { %v322_v23 = vsel %vm287_vm0, %v316_v21, 0.0  ;;  %v319_v24 = vsel %vm287_vm0, %v315_v22, 0.0 }
  0xa6   : > { %v299_v25 = vpop.xlane.xlu1 %298  ;;  %323 = vadd.xlane.f32.xlu0 %v322_v23  ;;  %320 = vadd.xlane.f32.xlu2 %v319_v24  ;;  %v296_v26 = vpop.xlane.xlu0 %295 }
  0xa7   : > { %v310_v27 = vmul.f32 %v306_v14, %v299_v25  ;;  %v309_v28 = vmul.f32 %v306_v14, %v296_v26 }
  0xa9   : > { %v1328_v29 = vsub.f32 %v286_v4, %v310_v27  ;;  %v1330_v30 = vsub.f32 %v285_v5, %v309_v28  ;;  %v383_v4 = vperm.slane %v275_v60, 0 }
  0xab   : > { %v318_v31 = vmul.f32 %v1328_v29, %v1328_v29  ;;  %v317_v32 = vmul.f32 %v1330_v30, %v1330_v30 }
  0xad   : > { %v328_v33 = vsel %vm287_vm0, %v318_v31, 0.0  ;;  %v325_v34 = vsel %vm287_vm0, %v317_v32, 0.0 }
  0xae   : > { %329 = vadd.xlane.f32.xlu1 %v328_v33  ;;  %326 = vadd.xlane.f32.xlu2 %v325_v34 }
 0x119   : > { %v321_v39 = vpop.xlane.xlu2 %320  ;;  %v324_v40 = vpop.xlane.xlu0 %323 }
 0x11a   : > { %v331_v41 = vmul.f32 %v321_v39, %v306_v14  ;;  %v332_v42 = vmul.f32 %v324_v40, %v306_v14 }
 0x11c   : > { %v335_v43 = vadd.f32 1e-05, %v331_v41  ;;  %v336_v44 = vadd.f32 1e-05, %v332_v42 }
 0x11e   : > { %1035 = vrsqrt.f32 %v335_v43  ;;  %vm345_vm3 = vweird.f32 %v335_v43  ;;  %vm355_vm4 = vweird.f32 %v336_v44 }
 0x11f   : > { %1037 = vrsqrt.f32 %v336_v44 }
 0x121   : > { %v330_v45 = vpop.xlane.xlu1 %329  ;;  %v327_v46 = vpop.xlane.xlu2 %326 }
 0x122   : > { %v334_v47 = vmul.f32 %v330_v45, %v306_v14  ;;  %v333_v48 = vmul.f32 %v327_v46, %v306_v14 }
 0x124   : > { %v1036_v49 = vpop.eup %1035  ;;  %v338_v50 = vadd.f32 1e-05, %v334_v47  ;;  %v337_v51 = vadd.f32 1e-05, %v333_v48 }
 0x125   : > { %v1038_v52 = vpop.eup %1037  ;;  %v340_v53 = vmul.f32 %v1036_v49, %v335_v43  ;;  %vm346_vm2 = vweird.f32 %v1036_v49 }
 0x126   : > { %v350_v54 = vmul.f32 %v1038_v52, %v336_v44  ;;  %1039 = vrsqrt.f32 %v338_v50  ;;  %vm356_vm5 = vweird.f32 %v1038_v52  ;;  %vm347_vm6 = vmor %vm345_vm3, %vm346_vm2  ;;  %vm375_vm8 = vweird.f32 %v338_v50 }
 0x127   : > { %v341_v55 = vmul.f32 %v1036_v49, %v340_v53  ;;  %1041 = vrsqrt.f32 %v337_v51  ;;  %vm357_vm7 = vmor %vm355_vm4, %vm356_vm5  ;;  %vm365_vm12 = vweird.f32 %v337_v51 }
 0x128   : > { %v351_v56 = vmul.f32 %v1038_v52, %v350_v54 }
 0x129   : > { %v342_v57 = vmul.f32 0.5, %v341_v55 }
 0x12a   : > { %v352_v58 = vmul.f32 0.5, %v351_v56 }
 0x12b   : > { %v343_v59 = vsub.f32 1.5, %v342_v57 }
 0x12c   : > { %v1040_v61 = vpop.eup %1039  ;;  %v353_v62 = vsub.f32 1.5, %v352_v58 }
 0x12d   : > { %v1042_v63 = vpop.eup %1041  ;;  %v344_v0 = vmul.f32 %v1036_v49, %v343_v59  ;;  %v370_v1 = vmul.f32 %v1040_v61, %v338_v50  ;;  %vm376_vm9 = vweird.f32 %v1040_v61 }
 0x12e   : > { %v354_v2 = vmul.f32 %v1038_v52, %v353_v62  ;;  %v360_v3 = vmul.f32 %v1042_v63, %v337_v51  ;;  %vm366_vm10 = vweird.f32 %v1042_v63  ;;  %vm377_vm11 = vmor %vm375_vm8, %vm376_vm9 }
 0x12f   : > { %v348_v5 = vsel %vm347_vm6, %v1036_v49, %v344_v0  ;;  %v371_v6 = vmul.f32 %v1040_v61, %v370_v1  ;;  %vm367_vm13 = vmor %vm365_vm12, %vm366_vm10 }
 0x130   : > { %v361_v7 = vmul.f32 %v1042_v63, %v360_v3  ;;  %v379_v8 = vmul.f32 %v348_v5, %v1320_v20  ;;  %v358_v10 = vsel %vm357_vm7, %v1038_v52, %v354_v2 }
 0x131   : > { %v372_v11 = vmul.f32 0.5, %v371_v6  ;;  %v380_v17 = vmul.f32 %v358_v10, %v1318_v19 }
 0x132   : > { %v362_v12 = vmul.f32 0.5, %v361_v7  ;;  %v384_v13 = vmul.f32 %v383_v4, %v379_v8 }
 0x133   : > { %v373_v14 = vsub.f32 1.5, %v372_v11  ;;  %v385_v22 = vmul.f32 %v383_v4, %v380_v17 }
 0x134   : > { %v363_v15 = vsub.f32 1.5, %v362_v12  ;;  %v389_v16 = vadd.f32 %v388_v9, %v384_v13 }
 0x135   : > { %v374_v18 = vmul.f32 %v1040_v61, %v373_v14  ;;  %v390_v26 = vadd.f32 %v388_v9, %v385_v22 }
 0x136   : > { %v364_v21 = vmul.f32 %v1042_v63, %v363_v15  ;;  %950 = vmatmul.msk.f32.vlgmr.msra.gmra.mxu0 %vm287_vm0, %v389_v16 }
 0x137   : > { %v378_v24 = vsel %vm377_vm11, %v1040_v61, %v374_v18 }
 0x138   : > { %v368_v20 = vsel %vm367_vm13, %v1042_v63, %v364_v21  ;;  %v382_v28 = vmul.f32 %v378_v24, %v1328_v29 }
 0x139   : > { %v381_v23 = vmul.f32 %v368_v20, %v1330_v30 }
 0x13a   : > { %v387_v19 = vmul.f32 %v383_v4, %v382_v28 }
 0x13b   : > { %v386_v25 = vmul.f32 %v383_v4, %v381_v23 }
 0x13c   : > { %v392_v31 = vadd.f32 %v388_v9, %v387_v19 }
 0x13d   : > { %v391_v27 = vadd.f32 %v388_v9, %v386_v25  ;;  %v280_v25 = vld [vmem:[%s1498_s3] sm:$0x7] }
 0x13e   : > { %951 = vmatmul.msk.f32.gmra.mxu0 %vm287_vm0, %v390_v26  ;;  %v556_v28 = vperm.slane %v280_v25, 1 }
 0x13f   : > { %952 = vmatmul.msk.f32.vlgmr.msra.gmra.mxu2 %vm287_vm0, %v391_v27 }
 0x147   : > { %953 = vmatmul.msk.f32.gmra.mxu2 %vm287_vm0, %v392_v31 }
 0x1b3   : > { %v1361_v32 = vpop.f32.mrf.mxu0 }
 0x1b4   : > { %v954_v33 = vmul.f32 -1.442695, %v1361_v32 }
 0x1b6   : > { %1043 = vpow2.f32 %v954_v33 }
 0x1bb   : > { %v1364_v30 = vpop.f32.mrf.mxu0 }
 0x1bc   : > { %v1044_v34 = vpop.eup %1043  ;;  %v955_v35 = vmul.f32 -1.442695, %v1364_v30 }
 0x1bd   : > { %v446_v36 = vadd.f32 1.0, %v1044_v34 }
 0x1be   : > { %1045 = vpow2.f32 %v955_v35  ;;  %v588_v35 = vperm.slane %v280_v25, 2 }
 0x1bf   : > { %1047 = vrcp.f32 %v446_v36  ;;  %v461_v43 = vand.u32 2147483648, %v446_v36  ;;  %v459_v46 = vand.u32 2147483647, %v446_v36  ;;  %vm455_vm15 = vweird.f32 %v446_v36 }
 0x1c1   : > { %v462_v52 = vor.u32 1.1754944e-38, %v461_v43  ;;  %vm460_vm2 = vcmp.eq.f32.partialorder %v459_v46, 8.507059e+37 }
 0x1c2   : > { %v1367_v29 = vpop.f32.mrf.mxu2 }
 0x1c3   : > { %v956_v37 = vmul.f32 -1.442695, %v1367_v29 }
 0x1c4   : > { %v1046_v38 = vpop.eup %1045 }
 0x1c5   : > { %v1048_v39 = vpop.eup %1047  ;;  %v447_v40 = vadd.f32 1.0, %v1046_v38  ;;  %1049 = vpow2.f32 %v956_v37 }
 0x1c6   : > { %v451_v41 = vmul.f32 %v1048_v39, %v446_v36  ;;  %vm456_vm14 = vweird.f32 %v1048_v39 }
 0x1c7   : > { %1051 = vrcp.f32 %v447_v40  ;;  %vm457_vm1 = vmor %vm455_vm15, %vm456_vm14  ;;  %v476_v57 = vand.u32 2147483648, %v447_v40  ;;  %v474_v59 = vand.u32 2147483647, %v447_v40  ;;  %vm470_vm4 = vweird.f32 %v447_v40 }
 0x1c8   : > { %v452_v42 = vsub.f32 1.0, %v451_v41  ;;  %vm534_vm15 = vcmask 1040384  }
 0x1c9   : > { %v477_v0 = vor.u32 1.1754944e-38, %v476_v57  ;;  %vm475_vm6 = vcmp.eq.f32.partialorder %v474_v59, 8.507059e+37 }
 0x1ca   : > { %v1370_v44 = vpop.f32.mrf.mxu2  ;;  %v453_v45 = vmul.f32 %v1048_v39, %v452_v42 }
 0x1cb   : > { %v1050_v47 = vpop.eup %1049  ;;  %v957_v48 = vmul.f32 -1.442695, %v1370_v44 }
 0x1cc   : > { %v448_v49 = vadd.f32 1.0, %v1050_v47  ;;  %v454_v50 = vadd.f32 %v1048_v39, %v453_v45 }
 0x1cd   : > { %v1052_v51 = vpop.eup %1051  ;;  %1053 = vpow2.f32 %v957_v48 }
 0x1ce   : > { %1055 = vrcp.f32 %v448_v49  ;;  %v458_v53 = vsel %vm457_vm1, %v1048_v39, %v454_v50  ;;  %v466_v54 = vmul.f32 %v1052_v51, %v447_v40  ;;  %vm471_vm3 = vweird.f32 %v1052_v51 }
 0x1cf   : > { %v463_v55 = vsel %vm460_vm2, %v462_v52, %v458_v53  ;;  %vm472_vm5 = vmor %vm470_vm4, %vm471_vm3  ;;  %v491_v5 = vand.u32 2147483648, %v448_v49  ;;  %v489_v7 = vand.u32 2147483647, %v448_v49  ;;  %vm485_vm8 = vweird.f32 %v448_v49 }
 0x1d0   : > { %514 = vrot.lane.b32.xlu2 %v463_v55, %s1180_s16  ;;  %v467_v56 = vsub.f32 1.0, %v466_v54  ;;  %vm569_vm1 = vcmask 1046528   ;;  %vm601_vm2 = vcmask 1045504   ;;  %vm620_vm3 = vcmask 64512  }
 0x1d1   : > { %v492_v10 = vor.u32 1.1754944e-38, %v491_v5  ;;  %vm490_vm10 = vcmp.eq.f32.partialorder %v489_v7, 8.507059e+37 }
 0x1d2   : > { %v468_v58 = vmul.f32 %v1052_v51, %v467_v56 }
 0x1d3   : > { %v1054_v60 = vpop.eup %1053 }
 0x1d4   : > { %v1056_v61 = vpop.eup %1055  ;;  %v449_v62 = vadd.f32 1.0, %v1054_v60  ;;  %v469_v63 = vadd.f32 %v1052_v51, %v468_v58 }
 0x1d5   : > { %v481_v1 = vmul.f32 %v1056_v61, %v448_v49  ;;  %vm486_vm7 = vweird.f32 %v1056_v61 }
 0x1d6   : > { %1057 = vrcp.f32 %v449_v62  ;;  %v473_v2 = vsel %vm472_vm5, %v1052_v51, %v469_v63  ;;  %vm487_vm9 = vmor %vm485_vm8, %vm486_vm7  ;;  %v506_v15 = vand.u32 2147483648, %v449_v62  ;;  %v504_v17 = vand.u32 2147483647, %v449_v62 }
 0x1d7   : > { %v478_v3 = vsel %vm475_vm6, %v477_v0, %v473_v2  ;;  %v482_v4 = vsub.f32 1.0, %v481_v1  ;;  %vm500_vm12 = vweird.f32 %v449_v62 }
 0x1d8   : > { %516 = vrot.lane.b32.xlu0 %v478_v3, %s1180_s16  ;;  %v507_v21 = vor.u32 1.1754944e-38, %v506_v15  ;;  %vm505_vm14 = vcmp.eq.f32.partialorder %v504_v17, 8.507059e+37 }
 0x1d9   : > { %v483_v6 = vmul.f32 %v1056_v61, %v482_v4 }
 0x1db   : > { %v484_v8 = vadd.f32 %v1056_v61, %v483_v6 }
 0x1dc   : > { %v1058_v9 = vpop.eup %1057 }
 0x1dd   : > { %v488_v11 = vsel %vm487_vm9, %v1056_v61, %v484_v8  ;;  %v496_v12 = vmul.f32 %v1058_v9, %v449_v62  ;;  %vm501_vm11 = vweird.f32 %v1058_v9 }
 0x1de   : > { %v493_v13 = vsel %vm490_vm10, %v492_v10, %v488_v11  ;;  %vm502_vm13 = vmor %vm500_vm12, %vm501_vm11 }
 0x1df   : > { %518 = vrot.lane.b32.xlu1 %v493_v13, %s1180_s16  ;;  %v497_v14 = vsub.f32 1.0, %v496_v12 }
 0x1e1   : > { %v498_v16 = vmul.f32 %v1058_v9, %v497_v14 }
 0x1e3   : > { %v499_v18 = vadd.f32 %v1058_v9, %v498_v16 }
 0x1e5   : > { %v503_v20 = vsel %vm502_vm13, %v1058_v9, %v499_v18 }
 0x1e6   : > { %v508_v22 = vsel %vm505_vm14, %v507_v21, %v503_v20 }
 0x1e7   : > { %520 = vrot.lane.b32.xlu2 %v508_v22, %s1180_s16  ;;  %s866_s16 = sshll.u32 %s863_s15, 4  ;;  %s867_s16 = int_to_ptr.hbm [resolvable:$true] %s866_s16 }
 0x1e8   : > { %s1123_s29 = sshra.s32 %s867_s16, 4  ;;  %s1124_s29 = int_to_ptr.hbm [resolvable:$true] %s1123_s29 }
 0x1e9   : > { %s1125_s12 = scalar_lea.hbm %s1124_s29, 32  ;;  %p1130_p0 = scmp.lt.s32.totalorder %s1124_s29, %s1501_s6 }
 0x1ea   : > { %p1126_p6 = scmp.ne.s32.totalorder %s1124_s29, %s1125_s12  ;;  %p1131_p1 = scmp.lt.s32.totalorder %s1129_s17, %s1125_s12 }
 0x1ec   : > { %p1127_p9 = pnand %p1126_p6, %p1268_p11  ;;  %p1132_p3 = por %p1131_p1, %p1130_p0 }
 0x1ee   : > { %p1128_p13 = pneg %p1127_p9 }
 0x1f0   : > { %p1133_p4 = pnand %p1132_p3, %p1128_p13 }
 0x22a   : > { %v515_v23 = vpop.permute.xlu2 %514 }
 0x22b   : > { %v526_v24 = vmul.f32 %v515_v23, %v1361_v32  ;;  %v551_v32 = vperm.slane %v280_v25, 0 }
 0x22d   : > { %v535_v26 = vrot.slane %v526_v24, 7 }
 0x22f   : > { %v547_v19 = vsel %vm534_vm15, 0.0, %v535_v26 }
 0x230   : > { %v557_v36 = vmul.f32 %v556_v28, %v547_v19  ;;  %v589_v46 = vmul.f32 %v588_v35, %v547_v19  ;;  %v552_v51 = vmul.f32 %v551_v32, %v547_v19 }
 0x232   : > { %v570_v45 = vrot.slane %v557_v36, 1  ;;  %v602_v58 = vrot.slane %v589_v46, 2 }
 0x241   : > { %v521_v27 = vpop.permute.xlu2 %520 }
 0x242   : > { %v529_v31 = vmul.f32 %v521_v27, %v1370_v44 }
 0x244   : > { %v539_v38 = vrot.slane %v529_v31, 7 }
 0x246   : > { %v550_v44 = vsel %vm534_vm15, %v539_v38, 0.0 }
 0x247   : > { %v562_v59 = vmul.f32 %v556_v28, %v550_v44  ;;  %v594_v62 = vmul.f32 %v588_v35, %v550_v44 }
 0x249   : > { %v578_v8 = vrot.slane %v562_v59, 1  ;;  %v610_v25 = vrot.slane %v594_v62, 2 }
 0x24a   : > { %v517_v33 = vpop.permute.xlu0 %516 }
 0x24b   : > { %v527_v34 = vmul.f32 %v517_v33, %v1364_v30 }
 0x24d   : > { %v536_v37 = vrot.slane %v527_v34, 7 }
 0x24f   : > { %v537_v39 = vsel %vm534_vm15, %v535_v26, %v536_v37  ;;  %v549_v40 = vsel %vm534_vm15, %v536_v37, 0.0 }
 0x250   : > { %v558_v41 = vmul.f32 %v556_v28, %v537_v39  ;;  %v559_v42 = vmul.f32 %v556_v28, %v549_v40  ;;  %v590_v43 = vmul.f32 %v588_v35, %v537_v39  ;;  %v591_v47 = vmul.f32 %v588_v35, %v549_v40 }
 0x251   : > { %v519_v48 = vpop.permute.xlu1 %518  ;;  %v553_v52 = vmul.f32 %v551_v32, %v537_v39 }
 0x252   : > { %v571_v30 = vrot.slane %v558_v41, 1  ;;  %v573_v49 = vrot.slane %v559_v42, 1  ;;  %v528_v50 = vmul.f32 %v519_v48, %v1367_v29  ;;  %v603_v53 = vrot.slane %v590_v43, 2 }
 0x253   : > { %v605_v54 = vrot.slane %v591_v47, 2 }
 0x254   : > { %v538_v55 = vrot.slane %v528_v50, 7  ;;  %v572_v56 = vsel %vm569_vm1, %v570_v45, %v571_v30  ;;  %v574_v57 = vsel %vm569_vm1, %v571_v30, %v573_v49  ;;  %v604_v2 = vsel %vm601_vm2, %v602_v58, %v603_v53 }
 0x255   : > { %v584_v60 = vadd.f32 %v572_v56, %v552_v51  ;;  %v585_v61 = vadd.f32 %v574_v57, %v553_v52  ;;  %v606_v3 = vsel %vm601_vm2, %v603_v53, %v605_v54 }
 0x256   : > { %v540_v63 = vsel %vm534_vm15, %v538_v55, %v539_v38  ;;  %v548_v0 = vsel %vm534_vm15, 0.0, %v538_v55 }
 0x257   : > { %v560_v29 = vmul.f32 %v556_v28, %v548_v0  ;;  %v561_v1 = vmul.f32 %v556_v28, %v540_v63  ;;  %v592_v4 = vmul.f32 %v588_v35, %v548_v0  ;;  %v593_v5 = vmul.f32 %v588_v35, %v540_v63 }
 0x258   : > { %v1394_v6 = vadd.f32 %v604_v2, %v584_v60  ;;  %v1396_v7 = vadd.f32 %v606_v3, %v585_v61  ;;  %v554_v9 = vmul.f32 %v551_v32, %v548_v0  ;;  %v555_v16 = vmul.f32 %v551_v32, %v540_v63  ;;  %v282_v0 = vld [vmem:[%s1500_s5] sm:$0xff] }
 0x259   : > { %v575_v10 = vrot.slane %v560_v29, 1  ;;  %v576_v11 = vrot.slane %v561_v1, 1  ;;  %v607_v12 = vrot.slane %v592_v4, 2  ;;  %v608_v13 = vrot.slane %v593_v5, 2  ;;  %832 = vmatpush.msra.mxu1 %v282_v0  ;;  %980 = vmatpush.msra.mxu3 %v282_v0 }
 0x25a   : > { %v621_v14 = vsel %vm620_vm3, %v1394_v6, 0.0  ;;  %v624_v15 = vsel %vm620_vm3, %v1396_v7, 0.0  ;;  %v647_v17 = vmul.f32 %v1394_v6, %v1394_v6  ;;  %v648_v26 = vmul.f32 %v1396_v7, %v1396_v7 }
 0x25b   : > { %622 = vadd.xlane.f32.xlu0 %v621_v14  ;;  %625 = vadd.xlane.f32.xlu2 %v624_v15  ;;  %v577_v18 = vsel %vm569_vm1, %v575_v10, %v576_v11  ;;  %v579_v20 = vsel %vm569_vm1, %v576_v11, %v578_v8  ;;  %v609_v23 = vsel %vm601_vm2, %v607_v12, %v608_v13 }
 0x25c   : > { %v586_v21 = vadd.f32 %v577_v18, %v554_v9  ;;  %v651_v22 = vsel %vm620_vm3, %v647_v17, 0.0  ;;  %v587_v24 = vadd.f32 %v579_v20, %v555_v16  ;;  %v611_v28 = vsel %vm601_vm2, %v608_v13, %v610_v25 }
 0x25d   : > { %652 = vadd.xlane.f32.xlu1 %v651_v22  ;;  %v654_v31 = vsel %vm620_vm3, %v648_v26, 0.0 }
 0x25e   : > { %v1410_v27 = vadd.f32 %v609_v23, %v586_v21  ;;  %v1413_v19 = vadd.f32 %v611_v28, %v587_v24  ;;  %v281_v28 = vld [vmem:[%s1499_s4] sm:$0x3] }
 0x260   : > { %v627_v33 = vsel %vm620_vm3, %v1410_v27, 0.0  ;;  %v630_v34 = vsel %vm620_vm3, %v1413_v19, 0.0  ;;  %v649_v35 = vmul.f32 %v1410_v27, %v1410_v27  ;;  %v650_v36 = vmul.f32 %v1413_v19, %v1413_v19 }
 0x262   : > { %v657_v37 = vsel %vm620_vm3, %v649_v35, 0.0  ;;  %v660_v38 = vsel %vm620_vm3, %v650_v36, 0.0 }
 0x263   : > { %655 = vadd.xlane.f32.xlu0 %v654_v31  ;;  %628 = vadd.xlane.f32.xlu2 %v627_v33 }
 0x265   : > { %631 = vadd.xlane.f32.xlu1 %v630_v34 }
 0x26b   : > { %658 = vadd.xlane.f32.xlu0 %v657_v37  ;;  %661 = vadd.xlane.f32.xlu2 %v660_v38  ;;  %v715_v37 = vperm.slane %v281_v28, 0 }
 0x2ce   : > { %v623_v32 = vpop.xlane.xlu0 %622  ;;  %v626_v39 = vpop.xlane.xlu2 %625 }
 0x2cf   : > { %v633_v40 = vadd.f32 %v626_v39, %v623_v32 }
 0x2d0   : > { %v653_v42 = vpop.xlane.xlu1 %652 }
 0x2d1   : > { %v634_v41 = vrot.slane %v633_v40, 4 }
 0x2d3   : > { %v635_v43 = vadd.f32 %v634_v41, %v633_v40  ;;  %v720_v40 = vperm.slane %v281_v28, 1 }
 0x2d5   : > { %v636_v45 = vrot.slane %v635_v43, 2 }
 0x2d6   : > { %v656_v46 = vpop.xlane.xlu0 %655  ;;  %v629_v47 = vpop.xlane.xlu2 %628 }
 0x2d7   : > { %v637_v48 = vadd.f32 %v636_v45, %v635_v43  ;;  %v663_v44 = vadd.f32 %v656_v46, %v653_v42 }
 0x2d8   : > { %v632_v50 = vpop.xlane.xlu1 %631 }
 0x2d9   : > { %v638_v30 = vrot.slane %v637_v48, 1  ;;  %v664_v49 = vrot.slane %v663_v44, 4  ;;  %v640_v51 = vadd.f32 %v632_v50, %v629_v47 }
 0x2db   : > { %v665_v52 = vadd.f32 %v664_v49, %v663_v44  ;;  %v641_v53 = vrot.slane %v640_v51, 4  ;;  %v639_v54 = vadd.f32 %v638_v30, %v637_v48 }
 0x2dd   : > { %v666_v55 = vrot.slane %v665_v52, 2  ;;  %v642_v56 = vadd.f32 %v641_v53, %v640_v51  ;;  %v677_v62 = vmul.f32 0.0078125, %v639_v54 }
 0x2de   : > { %v659_v57 = vpop.xlane.xlu0 %658  ;;  %v662_v58 = vpop.xlane.xlu2 %661 }
 0x2df   : > { %v667_v59 = vadd.f32 %v666_v55, %v665_v52  ;;  %v643_v60 = vrot.slane %v642_v56, 2  ;;  %v670_v61 = vadd.f32 %v662_v58, %v659_v57  ;;  %v681_v8 = vmul.f32 %v677_v62, %v677_v62 }
 0x2e0   : > { %v685_v34 = vsub.f32 %v1394_v6, %v677_v62  ;;  %v686_v35 = vsub.f32 %v1396_v7, %v677_v62 }
 0x2e1   : > { %v668_v63 = vrot.slane %v667_v59, 1  ;;  %v644_v29 = vadd.f32 %v643_v60, %v642_v56  ;;  %v671_v1 = vrot.slane %v670_v61, 4 }
 0x2e3   : > { %v669_v2 = vadd.f32 %v668_v63, %v667_v59  ;;  %v645_v3 = vrot.slane %v644_v29, 1  ;;  %v672_v4 = vadd.f32 %v671_v1, %v670_v61 }
 0x2e5   : > { %v679_v5 = vmul.f32 0.0078125, %v669_v2  ;;  %v646_v9 = vadd.f32 %v645_v3, %v644_v29  ;;  %v673_v10 = vrot.slane %v672_v4, 2 }
 0x2e7   : > { %v683_v11 = vsub.f32 %v679_v5, %v681_v8  ;;  %v674_v12 = vadd.f32 %v673_v10, %v672_v4  ;;  %v678_v14 = vmul.f32 0.0078125, %v646_v9 }
 0x2e9   : > { %v689_v13 = vadd.f32 1e-05, %v683_v11  ;;  %v675_v15 = vrot.slane %v674_v12, 1  ;;  %v682_v17 = vmul.f32 %v678_v14, %v678_v14  ;;  %v687_v30 = vsub.f32 %v1410_v27, %v678_v14 }
 0x2ea   : > { %v688_v49 = vsub.f32 %v1413_v19, %v678_v14 }
 0x2eb   : > { %1059 = vrsqrt.f32 %v689_v13  ;;  %v676_v16 = vadd.f32 %v675_v15, %v674_v12  ;;  %vm697_vm5 = vweird.f32 %v689_v13 }
 0x2ed   : > { %v680_v18 = vmul.f32 0.0078125, %v676_v16 }
 0x2ef   : > { %v684_v21 = vsub.f32 %v680_v18, %v682_v17 }
 0x2f1   : > { %v1060_v20 = vpop.eup %1059  ;;  %v690_v23 = vadd.f32 1e-05, %v684_v21 }
 0x2f2   : > { %v692_v22 = vmul.f32 %v1060_v20, %v689_v13  ;;  %vm698_vm4 = vweird.f32 %v1060_v20 }
 0x2f3   : > { %1061 = vrsqrt.f32 %v690_v23  ;;  %vm699_vm6 = vmor %vm697_vm5, %vm698_vm4  ;;  %vm707_vm8 = vweird.f32 %v690_v23 }
 0x2f4   : > { %v693_v24 = vmul.f32 %v1060_v20, %v692_v22 }
 0x2f6   : > { %v694_v25 = vmul.f32 0.5, %v693_v24 }
 0x2f8   : > { %v695_v26 = vsub.f32 1.5, %v694_v25 }
 0x2f9   : > { %v1062_v31 = vpop.eup %1061 }
 0x2fa   : > { %v696_v33 = vmul.f32 %v1060_v20, %v695_v26  ;;  %v702_v36 = vmul.f32 %v1062_v31, %v690_v23  ;;  %vm708_vm7 = vweird.f32 %v1062_v31 }
 0x2fb   : > { %vm709_vm9 = vmor %vm707_vm8, %vm708_vm7 }
 0x2fc   : > { %v700_v38 = vsel %vm699_vm6, %v1060_v20, %v696_v33  ;;  %v703_v32 = vmul.f32 %v1062_v31, %v702_v36 }
 0x2fd   : > { %v711_v39 = vmul.f32 %v700_v38, %v685_v34  ;;  %v712_v41 = vmul.f32 %v700_v38, %v686_v35 }
 0x2fe   : > { %v704_v42 = vmul.f32 0.5, %v703_v32 }
 0x2ff   : > { %v716_v43 = vmul.f32 %v715_v37, %v711_v39  ;;  %v717_v45 = vmul.f32 %v715_v37, %v712_v41 }
 0x300   : > { %v705_v46 = vsub.f32 1.5, %v704_v42 }
 0x301   : > { %v1434_v47 = vadd.f32 %v720_v40, %v716_v43  ;;  %v1436_v48 = vadd.f32 %v720_v40, %v717_v45 }
 0x302   : > { %v706_v44 = vmul.f32 %v1062_v31, %v705_v46 }
 0x303   : > { %v958_v6 = vmul.f32 -1.442695, %v1434_v47  ;;  %v959_v7 = vmul.f32 -1.442695, %v1436_v48 }
 0x304   : > { %v710_v50 = vsel %vm709_vm9, %v1062_v31, %v706_v44 }
 0x305   : > { %1063 = vpow2.f32 %v958_v6  ;;  %v713_v51 = vmul.f32 %v710_v50, %v687_v30  ;;  %v714_v52 = vmul.f32 %v710_v50, %v688_v49 }
 0x306   : > { %1065 = vpow2.f32 %v959_v7 }
 0x307   : > { %v718_v53 = vmul.f32 %v715_v37, %v713_v51  ;;  %v719_v54 = vmul.f32 %v715_v37, %v714_v52 }
 0x309   : > { %v1442_v55 = vadd.f32 %v720_v40, %v718_v53  ;;  %v1444_v56 = vadd.f32 %v720_v40, %v719_v54 }
 0x30b   : > { %v1064_v57 = vpop.eup %1063  ;;  %v960_v60 = vmul.f32 -1.442695, %v1442_v55  ;;  %v961_v19 = vmul.f32 -1.442695, %v1444_v56 }
 0x30c   : > { %v1066_v58 = vpop.eup %1065  ;;  %v737_v59 = vadd.f32 1.0, %v1064_v57 }
 0x30d   : > { %v738_v27 = vadd.f32 1.0, %v1066_v58 }
 0x30e   : > { %1067 = vrcp.f32 %v737_v59  ;;  %v750_v4 = vand.u32 2147483647, %v737_v59  ;;  %v752_v5 = vand.u32 2147483648, %v737_v59  ;;  %vm746_vm12 = vweird.f32 %v737_v59 }
 0x30f   : > { %1069 = vrcp.f32 %v738_v27  ;;  %v767_v11 = vand.u32 2147483648, %v738_v27  ;;  %v765_v13 = vand.u32 2147483647, %v738_v27  ;;  %vm761_vm14 = vweird.f32 %v738_v27 }
 0x310   : > { %1071 = vpow2.f32 %v960_v60  ;;  %v753_v15 = vor.u32 1.1754944e-38, %v752_v5  ;;  %vm751_vm15 = vcmp.eq.f32.partialorder %v750_v4, 8.507059e+37 }
 0x311   : > { %1073 = vpow2.f32 %v961_v19  ;;  %v768_v18 = vor.u32 1.1754944e-38, %v767_v11  ;;  %vm766_vm2 = vcmp.eq.f32.partialorder %v765_v13, 8.507059e+37 }
 0x314   : > { %v1068_v61 = vpop.eup %1067 }
 0x315   : > { %v1070_v62 = vpop.eup %1069  ;;  %v742_v63 = vmul.f32 %v1068_v61, %v737_v59  ;;  %vm747_vm10 = vweird.f32 %v1068_v61 }
 0x316   : > { %v1072_v0 = vpop.eup %1071  ;;  %v757_v29 = vmul.f32 %v1070_v62, %v738_v27  ;;  %vm762_vm11 = vweird.f32 %v1070_v62  ;;  %vm748_vm13 = vmor %vm746_vm12, %vm747_vm10 }
 0x317   : > { %v1074_v1 = vpop.eup %1073  ;;  %v743_v2 = vsub.f32 1.0, %v742_v63  ;;  %v739_v3 = vadd.f32 1.0, %v1072_v0  ;;  %vm763_vm1 = vmor %vm761_vm14, %vm762_vm11 }
 0x318   : > { %v758_v8 = vsub.f32 1.0, %v757_v29  ;;  %v740_v9 = vadd.f32 1.0, %v1074_v1 }
 0x319   : > { %v744_v10 = vmul.f32 %v1068_v61, %v743_v2  ;;  %1075 = vrcp.f32 %v739_v3  ;;  %v782_v34 = vand.u32 2147483648, %v739_v3  ;;  %v780_v37 = vand.u32 2147483647, %v739_v3 }
 0x31a   : > { %v759_v12 = vmul.f32 %v1070_v62, %v758_v8  ;;  %1077 = vrcp.f32 %v740_v9  ;;  %vm776_vm5 = vweird.f32 %v739_v3  ;;  %v797_v43 = vand.u32 2147483648, %v740_v9 }
 0x31b   : > { %v745_v14 = vadd.f32 %v1068_v61, %v744_v10  ;;  %v783_v39 = vor.u32 1.1754944e-38, %v782_v34  ;;  %vm781_vm7 = vcmp.eq.f32.partialorder %v780_v37, 8.507059e+37  ;;  %vm791_vm9 = vweird.f32 %v740_v9 }
 0x31c   : > { %v760_v16 = vadd.f32 %v1070_v62, %v759_v12  ;;  %v795_v46 = vand.u32 2147483647, %v740_v9 }
 0x31d   : > { %v749_v17 = vsel %vm748_vm13, %v1068_v61, %v745_v14 }
 0x31e   : > { %v754_v21 = vsel %vm751_vm15, %v753_v15, %v749_v17  ;;  %v764_v20 = vsel %vm763_vm1, %v1070_v62, %v760_v16  ;;  %vm796_vm11 = vcmp.eq.f32.partialorder %v795_v46, 8.507059e+37 }
 0x31f   : > { %v1076_v22 = vpop.eup %1075  ;;  %v801_v23 = vmul.f32 %v754_v21, %v1434_v47  ;;  %v769_v24 = vsel %vm766_vm2, %v768_v18, %v764_v20 }
 0x320   : > { %v1078_v25 = vpop.eup %1077  ;;  %v802_v26 = vmul.f32 %v769_v24, %v1436_v48  ;;  %v772_v28 = vmul.f32 %v1076_v22, %v739_v3  ;;  %vm777_vm4 = vweird.f32 %v1076_v22  ;;  %v798_v48 = vor.u32 1.1754944e-38, %v797_v43 }
 0x321   : > { %962 = vmatmul.msk.f32.vlgmr.msra.gmra.mxu1 %vm620_vm3, %v801_v23  ;;  %v787_v31 = vmul.f32 %v1078_v25, %v740_v9  ;;  %vm778_vm6 = vmor %vm776_vm5, %vm777_vm4  ;;  %vm792_vm8 = vweird.f32 %v1078_v25 }
 0x322   : > { %963 = vmatmul.msk.f32.vlgmr.msra.gmra.mxu3 %vm620_vm3, %v802_v26  ;;  %v773_v33 = vsub.f32 1.0, %v772_v28  ;;  %vm793_vm10 = vmor %vm791_vm9, %vm792_vm8 }
 0x323   : > { %v788_v35 = vsub.f32 1.0, %v787_v31 }
 0x324   : > { %v774_v36 = vmul.f32 %v1076_v22, %v773_v33 }
 0x325   : > { %v789_v38 = vmul.f32 %v1078_v25, %v788_v35 }
 0x326   : > { %v775_v32 = vadd.f32 %v1076_v22, %v774_v36 }
 0x327   : > { %v790_v41 = vadd.f32 %v1078_v25, %v789_v38 }
 0x328   : > { %v779_v40 = vsel %vm778_vm6, %v1076_v22, %v775_v32 }
 0x329   : > { %v784_v42 = vsel %vm781_vm7, %v783_v39, %v779_v40  ;;  %v794_v47 = vsel %vm793_vm10, %v1078_v25, %v790_v41 }
 0x32a   : > { %v803_v45 = vmul.f32 %v784_v42, %v1442_v55  ;;  %v799_v6 = vsel %vm796_vm11, %v798_v48, %v794_v47 }
 0x32b   : > { %v804_v7 = vmul.f32 %v799_v6, %v1444_v56 }
 0x32c   : > { %964 = vmatmul.msk.f32.gmra.mxu3 %vm620_vm3, %v803_v45 }
 0x334   : > { %965 = vmatmul.msk.f32.gmra.mxu3 %vm620_vm3, %v804_v7 }
 0x39e   : > { %v834_v44 = vpop.f32.mrf.mxu1 }
 0x39f   : > { %846 = vst.msk [vmem:[%s272_s26] sm:$0xff] %vm287_vm0, %v834_v44 }
 0x3a5   : > { %v837_v30 = vpop.f32.mrf.mxu3 }
 0x3a6   : > { %847 = vst.msk [vmem:[%s272_s26 + $0x8] sm:$0xff] %vm287_vm0, %v837_v30 }
 0x3af   : > { %v840_v49 = vpop.f32.mrf.mxu3 }
 0x3b0   : > { %848 = vst.msk [vmem:[%s272_s26 + $0x10] sm:$0xff] %vm287_vm0, %v840_v49 }
 0x3b7   : > { %v843_v50 = vpop.f32.mrf.mxu3 }
 0x3b8   : > { %849 = vst.msk [vmem:[%s272_s26 + $0x18] sm:$0xff] %vm287_vm0, %v843_v50 }
 0x3b9   : > { %1136 = shalt.err (!%p1133_p4)
}
 0x3ba   : > { %s1181_s18 = smov 128   ;;  %s1182_s26 = smov 8  }
 0x3bb   : > { %983 = dma.vmem_to_hbm [thread:$0]  (%p1268_p11), %s865_s11, 512, %s867_s16, %s851_s28, %s1181_s18, %s1181_s18, %s1182_s26  }
 0x3bc PF: > { %s881_s13 = sand.u32 1, %s1163_s21   ;;  %p1507_p7 = scmp.ge.s32.totalorder %s1175_s24, 2 }
 0x3bd   : > { %s882_s7 = scalar_lea.sflag [#allocation4], %s881_s13 }
 0x3be   : > { %p990_p5 = pnand %p1507_p7, %p1272_p12 }
 0x3c0   : > { %p991_p8 = pneg %p990_p5 }
 0x3c2   : > { %1158 = dma.done.wait (%p991_p8), %s882_s7, 512  }
 0x3c3   : > { %1160 = vsyncadd (%p991_p8), %s882_s7, 4294966784  ;;  %p19_p10 = scmp.ge.s32.totalorder %s1243_s27, 4   ;;  %s1508_s21 = smov %s1167_s22 }
 0x3c4   : > { %s1509_s22 = smov %s1171_s23  ;;  %s1510_s23 = smov %s1255_s30 }
 0x3c5   : > { %s1511_s24 = smov %s1243_s27  ;;  %21 = sbr.rel (!%p19_p10) target bundleno = 5 (0x5), region = 89 }
 0x3ca   :  { %888 = vsyncpa [#allocation3], 1 }
 0x3cb   :  { %890 = vsyncpa [#allocation3 + $0x1], 1 }
 0x3cc   :  { %891 = vsyncpa [#allocation4], 1 }
 0x3cd   :  { %893 = vsyncpa [#allocation4 + $0x1], 1 }

</bundles_post_ra>
